<compile_context>
chip_gen: v7x
topology: tpu7x:2x2x1
jax: 0.10.0
libtpu: 0.0.40
codegen_flags: <defaults>
</compile_context>

<pallas_src>
import jax
import jax.numpy as jnp
from jax.experimental import pallas as pl
from jax.experimental.pallas import tpu as pltpu


_LANE = 128
_MAX_TILE_R = 2048  # 2048 * 128 * 4 B = 1 MiB per f32 input tile


def _dice_bce_kernel(x_ref, t_ref, out_ref, acc_ref):
    """Grid = (batch, chunk).  Accumulate partials over chunks of one batch elem."""
    c = pl.program_id(1)

    # ---- reset accumulators at the start of each batch element ---------------
    @pl.when(c == 0)
    def _():
        acc_ref[...] = jnp.zeros_like(acc_ref)

    x = x_ref[0].astype(jnp.float32)  # (tile_r, 128) block of `input` (probs)
    t = t_ref[0].astype(jnp.float32)  # (tile_r, 128) block of `target`

    # ---- binary cross entropy, elementwise (PyTorch clamps log at -100) ------
    log_x = jnp.maximum(jnp.log(x), jnp.float32(-100.0))
    log_1mx = jnp.maximum(jnp.log(1.0 - x), jnp.float32(-100.0))
    bce = -(t * log_x + (1.0 - t) * log_1mx)

    r = x.shape[0]

    def fold(v):
        # (tile_r, 128) -> (8, 128) partial sums; pure vector adds, no XLU.
        return jnp.sum(v.reshape(r // 8, 8, _LANE), axis=0)

    acc_ref[0] += fold(bce)      # BCE partial sum
    acc_ref[1] += fold(x * t)    # dice intersection partial
    acc_ref[2] += fold(x + t)    # dice union partial (sum(x)+sum(t) fused)

    # ---- emit per-batch partials on the last chunk ----------------------------
    @pl.when(c == pl.num_programs(1) - 1)
    def _():
        out_ref[...] = acc_ref[...][None]


def dice_with_bce_loss(inp, target, *, smoother=1.0, bce_weight=0.001):
    """inp, target: (B, ...) float arrays; inp in (0, 1). Returns scalar loss."""
    assert inp.shape == target.shape
    B = inp.shape[0]
    n_per_batch = 1
    for d in inp.shape[1:]:
        n_per_batch *= int(d)
    n_total = B * n_per_batch

    # --- re-layout: (B, N) -> zero-padded (B, R_pad, 128), lane/sublane dense --
    x = inp.reshape(B, n_per_batch)
    t = target.reshape(B, n_per_batch)

    rows = pl.cdiv(n_per_batch, _LANE)
    tile_r = min(_MAX_TILE_R, ((rows + 7) // 8) * 8)   # multiple of 8 sublanes
    n_chunks = pl.cdiv(rows, tile_r)
    rows_pad = n_chunks * tile_r
    pad = rows_pad * _LANE - n_per_batch
    if pad:
        # Zero padding contributes exactly 0 to the BCE sum, intersection, union.
        x = jnp.pad(x, ((0, 0), (0, pad)))
        t = jnp.pad(t, ((0, 0), (0, pad)))
    x = x.reshape(B, rows_pad, _LANE)
    t = t.reshape(B, rows_pad, _LANE)

    blk = pl.BlockSpec((1, tile_r, _LANE), lambda b, c: (b, c, 0))
    out_spec = pl.BlockSpec((1, 3, 8, _LANE), lambda b, c: (b, 0, 0, 0))

    n_padded = B * rows_pad * _LANE
    partials = pl.pallas_call(
        _dice_bce_kernel,
        out_shape=jax.ShapeDtypeStruct((B, 3, 8, _LANE), jnp.float32),
        grid_spec=pltpu.PrefetchScalarGridSpec(
            num_scalar_prefetch=0,
            grid=(B, n_chunks),
            in_specs=[blk, blk],
            out_specs=out_spec,
            scratch_shapes=[pltpu.VMEM((3, 8, _LANE), jnp.float32)],
        ),
        compiler_params=pltpu.CompilerParams(
            dimension_semantics=("parallel", "arbitrary")),
        cost_estimate=pl.CostEstimate(
            flops=10 * n_padded,
            transcendentals=2 * n_padded,
            bytes_accessed=2 * n_padded * inp.dtype.itemsize),
    )(x, t)

    # --- tiny finalize in plain JAX (keeps the batch axis 'parallel' in-kernel) -
    sums = jnp.sum(partials, axis=(2, 3))            # (B, 3)
    bce_sum = sums[:, 0]
    inter = sums[:, 1]
    union = sums[:, 2]
    bce_mean = jnp.sum(bce_sum) / jnp.float32(n_total)
    dice = (2.0 * inter + jnp.float32(smoother)) / (union + jnp.float32(smoother))
    return jnp.float32(bce_weight) * bce_mean - jnp.mean(dice)


def _reference(inp, target, smoother=1.0, bce_weight=0.001):
    x = inp.astype(jnp.float32)
    t = target.astype(jnp.float32)
    log_x = jnp.maximum(jnp.log(x), -100.0)
    log_1mx = jnp.maximum(jnp.log(1.0 - x), -100.0)
    bce = jnp.mean(-(t * log_x + (1.0 - t) * log_1mx))
    inter = jnp.sum(x * t, axis=(1, 2, 3))
    union = jnp.sum(x, axis=(1, 2, 3)) + jnp.sum(t, axis=(1, 2, 3))
    dice = (2.0 * inter + smoother) / (union + smoother)
    return jnp.mean(bce_weight * bce - dice)


if __name__ == "__main__":
    key = jax.random.PRNGKey(0)
    k1, k2 = jax.random.split(key)
    B, C, H, W = 2, 4, 16, 16
    # `input` must be probabilities in (0, 1) for binary_cross_entropy.
    inp = jax.random.uniform(k1, (B, C, H, W), jnp.float32,
                             minval=1e-4, maxval=1.0 - 1e-4)
    # target in [0, 1] (hard labels here; soft labels also valid for BCE).
    target = (jax.random.uniform(k2, (B, C, H, W), jnp.float32) > 0.5
              ).astype(jnp.float32)

    loss = dice_with_bce_loss(inp, target, smoother=1.0, bce_weight=0.001)
    loss = jax.block_until_ready(loss)

    ref = jax.block_until_ready(_reference(inp, target))
    assert jnp.allclose(loss, ref, rtol=1e-5, atol=1e-5), (loss, ref)
    print("KERNEL_OK")
</pallas_src>

<mosaic_0001>
module attributes {stable_mosaic.version = 11 : i64} {
  func.func @_dice_bce_kernel(%arg0: i32, %arg1: i32, %arg2: memref<1x8x128xf32, #tpu.memory_space<vmem>>, %arg3: memref<1x8x128xf32, #tpu.memory_space<vmem>>, %arg4: memref<1x3x8x128xf32, #tpu.memory_space<vmem>>, %arg5: memref<3x8x128xf32, #tpu.memory_space<vmem>>) attributes {dimension_semantics = [#tpu.dimension_semantics<parallel>, #tpu.dimension_semantics<arbitrary>], iteration_bounds = array<i64: 2, 1>, scalar_prefetch = 0 : i64, scratch_operands = 1 : i64, tpu.core_type = #tpu.core_type<tc>, window_params = [{transform_indices = @transform_0, window_bounds = array<i64: 1, 8, 128>}, {transform_indices = @transform_1, window_bounds = array<i64: 1, 8, 128>}, {transform_indices = @transform_2, window_bounds = array<i64: 1, 3, 8, 128>}]} {
    %c0_i32 = arith.constant 0 : i32
    %0 = arith.cmpi eq, %arg1, %c0_i32 : i32
    %1 = arith.extui %0 : i1 to i32
    %c0_i32_0 = arith.constant 0 : i32
    %2 = arith.cmpi ne, %1, %c0_i32_0 : i32
    scf.if %2 {
      %cst_31 = arith.constant 0.000000e+00 : f32
      %51 = vector.broadcast %cst_31 : f32 to vector<3x8x128xf32>
      %c0_32 = arith.constant 0 : index
      %c0_33 = arith.constant 0 : index
      %c0_34 = arith.constant 0 : index
      %52 = vector.load %arg5[%c0_32, %c0_33, %c0_34] : memref<3x8x128xf32, #tpu.memory_space<vmem>>, vector<3x8x128xf32>
      tpu.vector_store %arg5[%c0_32, %c0_33, %c0_34], %51 {strides = array<i32>} : memref<3x8x128xf32, #tpu.memory_space<vmem>>, vector<3x8x128xf32>,
    } else {
    }
    %c0 = arith.constant 0 : index
    %c0_1 = arith.constant 0 : index
    %c0_2 = arith.constant 0 : index
    %3 = vector.load %arg2[%c0, %c0_1, %c0_2] : memref<1x8x128xf32, #tpu.memory_space<vmem>>, vector<1x8x128xf32>
    %4 = vector.shape_cast %3 : vector<1x8x128xf32> to vector<8x128xf32>
    %c0_3 = arith.constant 0 : index
    %c0_4 = arith.constant 0 : index
    %c0_5 = arith.constant 0 : index
    %5 = vector.load %arg3[%c0_3, %c0_4, %c0_5] : memref<1x8x128xf32, #tpu.memory_space<vmem>>, vector<1x8x128xf32>
    %6 = vector.shape_cast %5 : vector<1x8x128xf32> to vector<8x128xf32>
    %7 = math.log %4 : vector<8x128xf32>
    %cst = arith.constant -1.000000e+02 : f32
    %8 = vector.broadcast %cst : f32 to vector<8x128xf32>
    %9 = arith.maximumf %7, %8 : vector<8x128xf32>
    %cst_6 = arith.constant 1.000000e+00 : f32
    %10 = vector.broadcast %cst_6 : f32 to vector<8x128xf32>
    %11 = arith.subf %10, %4 : vector<8x128xf32>
    %12 = math.log %11 : vector<8x128xf32>
    %cst_7 = arith.constant -1.000000e+02 : f32
    %13 = vector.broadcast %cst_7 : f32 to vector<8x128xf32>
    %14 = arith.maximumf %12, %13 : vector<8x128xf32>
    %15 = arith.mulf %6, %9 : vector<8x128xf32>
    %cst_8 = arith.constant 1.000000e+00 : f32
    %16 = vector.broadcast %cst_8 : f32 to vector<8x128xf32>
    %17 = arith.subf %16, %6 : vector<8x128xf32>
    %18 = arith.mulf %17, %14 : vector<8x128xf32>
    %19 = arith.addf %15, %18 : vector<8x128xf32>
    %cst_9 = arith.constant 0.000000e+00 : f32
    %20 = vector.broadcast %cst_9 : f32 to vector<8x128xf32>
    %21 = arith.subf %20, %19 : vector<8x128xf32>
    %c0_10 = arith.constant 0 : index
    %c0_11 = arith.constant 0 : index
    %c0_12 = arith.constant 0 : index
    %22 = vector.load %arg5[%c0_10, %c0_11, %c0_12] : memref<3x8x128xf32, #tpu.memory_space<vmem>>, vector<1x8x128xf32>
    %23 = vector.shape_cast %22 : vector<1x8x128xf32> to vector<8x128xf32>
    %24 = vector.shape_cast %21 : vector<8x128xf32> to vector<1x8x128xf32>
    %cst_13 = arith.constant dense<0.000000e+00> : vector<8x128xf32>
    %25 = vector.multi_reduction <add>, %24, %cst_13 [0] : vector<1x8x128xf32> to vector<8x128xf32>
    %26 = arith.addf %23, %25 : vector<8x128xf32>
    %c0_14 = arith.constant 0 : index
    %c0_15 = arith.constant 0 : index
    %c0_16 = arith.constant 0 : index
    %27 = vector.load %arg5[%c0_14, %c0_15, %c0_16] : memref<3x8x128xf32, #tpu.memory_space<vmem>>, vector<1x8x128xf32>
    %28 = vector.shape_cast %27 : vector<1x8x128xf32> to vector<8x128xf32>
    %29 = vector.shape_cast %26 : vector<8x128xf32> to vector<1x8x128xf32>
    tpu.vector_store %arg5[%c0_14, %c0_15, %c0_16], %29 {strides = array<i32>} : memref<3x8x128xf32, #tpu.memory_space<vmem>>, vector<1x8x128xf32>,
    %c1 = arith.constant 1 : index
    %c0_17 = arith.constant 0 : index
    %c0_18 = arith.constant 0 : index
    %30 = vector.load %arg5[%c1, %c0_17, %c0_18] : memref<3x8x128xf32, #tpu.memory_space<vmem>>, vector<1x8x128xf32>
    %31 = vector.shape_cast %30 : vector<1x8x128xf32> to vector<8x128xf32>
    %32 = arith.mulf %4, %6 : vector<8x128xf32>
    %33 = vector.shape_cast %32 : vector<8x128xf32> to vector<1x8x128xf32>
    %cst_19 = arith.constant dense<0.000000e+00> : vector<8x128xf32>
    %34 = vector.multi_reduction <add>, %33, %cst_19 [0] : vector<1x8x128xf32> to vector<8x128xf32>
    %35 = arith.addf %31, %34 : vector<8x128xf32>
    %c1_20 = arith.constant 1 : index
    %c0_21 = arith.constant 0 : index
    %c0_22 = arith.constant 0 : index
    %36 = vector.load %arg5[%c1_20, %c0_21, %c0_22] : memref<3x8x128xf32, #tpu.memory_space<vmem>>, vector<1x8x128xf32>
    %37 = vector.shape_cast %36 : vector<1x8x128xf32> to vector<8x128xf32>
    %38 = vector.shape_cast %35 : vector<8x128xf32> to vector<1x8x128xf32>
    tpu.vector_store %arg5[%c1_20, %c0_21, %c0_22], %38 {strides = array<i32>} : memref<3x8x128xf32, #tpu.memory_space<vmem>>, vector<1x8x128xf32>,
    %c2 = arith.constant 2 : index
    %c0_23 = arith.constant 0 : index
    %c0_24 = arith.constant 0 : index
    %39 = vector.load %arg5[%c2, %c0_23, %c0_24] : memref<3x8x128xf32, #tpu.memory_space<vmem>>, vector<1x8x128xf32>
    %40 = vector.shape_cast %39 : vector<1x8x128xf32> to vector<8x128xf32>
    %41 = arith.addf %4, %6 : vector<8x128xf32>
    %42 = vector.shape_cast %41 : vector<8x128xf32> to vector<1x8x128xf32>
    %cst_25 = arith.constant dense<0.000000e+00> : vector<8x128xf32>
    %43 = vector.multi_reduction <add>, %42, %cst_25 [0] : vector<1x8x128xf32> to vector<8x128xf32>
    %44 = arith.addf %40, %43 : vector<8x128xf32>
    %c2_26 = arith.constant 2 : index
    %c0_27 = arith.constant 0 : index
    %c0_28 = arith.constant 0 : index
    %45 = vector.load %arg5[%c2_26, %c0_27, %c0_28] : memref<3x8x128xf32, #tpu.memory_space<vmem>>, vector<1x8x128xf32>
    %46 = vector.shape_cast %45 : vector<1x8x128xf32> to vector<8x128xf32>
    %47 = vector.shape_cast %44 : vector<8x128xf32> to vector<1x8x128xf32>
    tpu.vector_store %arg5[%c2_26, %c0_27, %c0_28], %47 {strides = array<i32>} : memref<3x8x128xf32, #tpu.memory_space<vmem>>, vector<1x8x128xf32>,
    %c0_i32_29 = arith.constant 0 : i32
    %48 = arith.cmpi eq, %arg1, %c0_i32_29 : i32
    %49 = arith.extui %48 : i1 to i32
    %c0_i32_30 = arith.constant 0 : i32
    %50 = arith.cmpi ne, %49, %c0_i32_30 : i32
    scf.if %50 {
      %c0_31 = arith.constant 0 : index
      %c0_32 = arith.constant 0 : index
      %c0_33 = arith.constant 0 : index
      %51 = vector.load %arg5[%c0_31, %c0_32, %c0_33] : memref<3x8x128xf32, #tpu.memory_space<vmem>>, vector<3x8x128xf32>
      %52 = vector.shape_cast %51 : vector<3x8x128xf32> to vector<1x3x8x128xf32>
      %c0_34 = arith.constant 0 : index
      %c0_35 = arith.constant 0 : index
      %c0_36 = arith.constant 0 : index
      %c0_37 = arith.constant 0 : index
      %53 = vector.load %arg4[%c0_34, %c0_35, %c0_36, %c0_37] : memref<1x3x8x128xf32, #tpu.memory_space<vmem>>, vector<1x3x8x128xf32>
      tpu.vector_store %arg4[%c0_34, %c0_35, %c0_36, %c0_37], %52 {strides = array<i32>} : memref<1x3x8x128xf32, #tpu.memory_space<vmem>>, vector<1x3x8x128xf32>,
    } else {
    }
    return
  }
  func.func @transform_0(%arg0: i32, %arg1: i32) -> (i32, i32, i32) {
    %c0_i32 = arith.constant 0 : i32
    %c0_i32_0 = arith.constant 0 : i32
    return %arg0, %arg1, %c0_i32 : i32, i32, i32
  }
  func.func @transform_1(%arg0: i32, %arg1: i32) -> (i32, i32, i32) {
    %c0_i32 = arith.constant 0 : i32
    %c0_i32_0 = arith.constant 0 : i32
    return %arg0, %arg1, %c0_i32 : i32, i32, i32
  }
  func.func @transform_2(%arg0: i32, %arg1: i32) -> (i32, i32, i32, i32) {
    %c0_i32 = arith.constant 0 : i32
    %c0_i32_0 = arith.constant 0 : i32
    %c0_i32_1 = arith.constant 0 : i32
    %c0_i32_2 = arith.constant 0 : i32
    return %arg0, %c0_i32, %c0_i32_0, %c0_i32_1 : i32, i32, i32, i32
  }
}

</mosaic_0001>

<bundles_post_ra>
// kernel: tpu_custom_call.1
= control target key start
LH: loop header
LB: loop body
LE: loop exit
PB: predicated region body
PF: predicated region fallthrough
CT: control target
= control target key end

     0   :  { %7 = vsyncpa [#allocation4], 0  ;;  %s860_s0 = inlined_call_operand.hbm [shape: f32[2,8,128], index: 0, kind: input, shape index: {}]   ;;  %s861_s1 = inlined_call_operand.hbm [shape: f32[2,8,128], index: 1, kind: input, shape index: {}]   ;;  %s862_s2 = inlined_call_operand.hbm [shape: f32[2,3,8,128], index: 2, kind: output, shape index: {}]  }
   0x1   :  { %9 = vsyncpa [#allocation4 + $0x1], 0 }
   0x2   :  { %10 = vsyncpa [#allocation7], 0 }
   0x3   :  { %12 = vsyncpa [#allocation7 + $0x1], 0 }
   0x4   :  { %13 = vsyncpa [#allocation5], 0 }
   0x5   :  { %15 = vsyncpa [#allocation5 + $0x1], 0  ;;  %s637_s9 = smov 0   ;;  %s639_s10 = smov 0  }
   0x6   :  { %s641_s11 = smov 0   ;;  %s643_s12 = smov 0  }
   0x7   :  { %s645_s13 = smov 0   ;;  %s647_s14 = smov 0  }
   0x8 LB: > { %s380_s15 = sadd.s32 4294967295, %s615_s14   ;;  %s381_s16 = sadd.s32 4294967294, %s615_s14   ;;  %s615_s14 = sphi %s647_s14, %s21_s14   ;;  %s611_s13 = sphi %s645_s13, %s882_s13   ;;  %s607_s12 = sphi %s643_s12, %s881_s12   ;;  %s603_s11 = sphi %s641_s11, %s880_s11   ;;  %s599_s10 = sphi %s639_s10, %s879_s10   ;;  %s595_s9 = sphi %s637_s9, %s878_s9  }
   0x9   : > { %s33_s17 = sadd.s32 1, %s611_s13  ;;  %s42_s18 = sadd.s32 1, %s603_s11 }
   0xa   : > { %p35_p0 = scmp.ge.s32.totalorder %s33_s17, 2  ;;  %p49_p1 = scmp.ne.s32.totalorder %s603_s11, %s599_s10 }
   0xb   : > { %p50_p2 = scmp.eq.s32.totalorder %s615_s14, 0  ;;  %p55_p3 = scmp.ne.s32.totalorder %s599_s10, %s595_s9 }
   0xc   : > { %s884_s17 = smov (%p35_p0, %s33_s17), 0  ;;  %p56_p5 = scmp.eq.s32.totalorder %s380_s15, 0 }
   0xd   : > { %p678_p4 = por %p50_p2, %p49_p1  ;;  %s37_s20 = ssub.s32 %s611_s13, %s884_s17 }
   0xe   : > { %p107_p6 = scmp.eq.s32.totalorder %s380_s15, 1  ;;  %p40_p7 = scmp.eq.s32.totalorder %s37_s20, 0 }
   0xf   : > { %p684_p8 = por %p56_p5, %p55_p3  ;;  %p113_p10 = scmp.eq.s32.totalorder %s381_s16, 1 }
  0x10   : > { %p688_p9 = por %p107_p6, %p49_p1  ;;  %p413_p13 = scmp.lt.s32.totalorder %s615_s14, 2 }
  0x11   : > { %s866_s21 = scalar_select %p684_p8, 1, 0 }
  0x12   : > { %s867_s22 = scalar_select %p688_p9, 1, 0 }
  0x13   : > { %s693_s23 = scalar_select %p40_p7, %s603_s11, %s42_s18  }
  0x14   : > { %p695_p11 = por %p113_p10, %p55_p3  ;;  %s702_s25 = sand.u32 1, %s603_s11  }
  0x15   : > { %s384_s26 = sshll.u32 %s702_s25, 3  ;;  %s385_s27 = sshll.u32 %s611_s13, 7 }
  0x16   : > { %s868_s24 = scalar_select %p695_p11, 1, 0 }
  0x17   : > { %s711_s30 = scalar_lea.hbm %s860_s0, %s385_s27  ;;  %s137_s3 = scalar_lea.vmem [#allocation3], %s384_s26 }
  0x18   : > { %s145_s4 = sshll.u32 %s137_s3, 4  ;;  %p719_p0 = pnand %p413_p13, %p678_p4  ;;  %s715_s4 = int_to_ptr.vmem [resolvable:$true] %s145_s4 }
  0x19   : > { %s134_s6 = scalar_lea.sflag [#allocation4], %s702_s25  ;;  %s469_s7 = scalar_lea.hbm %s711_s30, 128 }
  0x1a   : > { %p470_p3 = scmp.ne.s32.totalorder %s711_s30, %s469_s7  ;;  %p471_p5 = pneg %p719_p0 }
  0x1b   : > { %s474_s16 = scalar_lea.hbm %s860_s0, 256  ;;  %p475_p4 = scmp.lt.u32.totalorder %s711_s30, %s860_s0 }
  0x1c   : > { %p472_p6 = pnand %p471_p5, %p470_p3  ;;  %p476_p10 = scmp.lt.u32.totalorder %s474_s16, %s469_s7 }
  0x1d   : > { %p478_p12 = scmp.lt.u32.totalorder %s469_s7, %s711_s30 }
  0x1e   : > { %p473_p7 = pneg %p472_p6  ;;  %p477_p13 = por %p476_p10, %p475_p4 }
  0x20   : > { %p479_p1 = por %p478_p12, %p477_p13 }
  0x22   : > { %p480_p2 = pnand %p479_p1, %p473_p7 }
  0x24   : > { %483 = shalt.err (!%p480_p2)
}
  0x25   : > { %s484_s20 = scalar_lea.vmem %s715_s4, 128  ;;  %s617_s28 = smov [#allocation3]  }
  0x26   : > { %p485_p3 = scmp.ne.s32.totalorder %s715_s4, %s484_s20  ;;  %s489_s29 = sshll.u32 %s617_s28, 4  ;;  %s490_s29 = int_to_ptr.vmem [resolvable:$false] %s489_s29 }
  0x27   : > { %s491_s3 = scalar_lea.vmem %s490_s29, 256  ;;  %p492_p9 = scmp.lt.s32.totalorder %s715_s4, %s490_s29 }
  0x28   : > { %p487_p6 = pnand %p485_p3, %p471_p5  ;;  %p493_p4 = scmp.lt.s32.totalorder %s491_s3, %s484_s20 }
  0x2a   : > { %p488_p11 = pneg %p487_p6  ;;  %p494_p10 = por %p493_p4, %p492_p9 }
  0x2c   : > { %p495_p12 = pnand %p494_p10, %p488_p11 }
  0x2e   : > { %498 = shalt.err (!%p495_p12)
}
  0x2f   : > { %405 = dma.hbm_to_vmem [thread:$0]  (!%p719_p0), %s711_s30, 128, %s715_s4, %s134_s6  }
  0x30   : > { %p870_p1 = scmp.lt.s32.totalorder %s615_s14, 3  ;;  %p871_p2 = scmp.ge.s32.totalorder %s615_s14, 1 }
  0x31   : > { %s764_s16 = scalar_lea.hbm %s861_s1, %s385_s27  ;;  %s156_s18 = scalar_lea.vmem [#allocation6], %s384_s26 }
  0x32   : > { %p755_p7 = pnand %p871_p2, %p870_p1  ;;  %s164_s19 = sshll.u32 %s156_s18, 4  ;;  %s165_s19 = int_to_ptr.vmem [resolvable:$true] %s164_s19 }
  0x33   : > { %s153_s30 = scalar_lea.sflag [#allocation7], %s702_s25  ;;  %s499_s4 = scalar_lea.hbm %s764_s16, 128 }
  0x34   : > { %s872_s7 = scalar_select %p755_p7, 1, 0 }
  0x35   : > { %p500_p9 = scmp.ne.s32.totalorder %s764_s16, %s499_s4  ;;  %s504_s27 = scalar_lea.hbm %s861_s1, 256 }
  0x36   : > { %p505_p3 = scmp.lt.u32.totalorder %s764_s16, %s861_s1  ;;  %p506_p6 = scmp.lt.u32.totalorder %s504_s27, %s499_s4 }
  0x37   : > { %p502_p11 = pnand %p500_p9, %p471_p5  ;;  %p508_p10 = scmp.lt.u32.totalorder %s499_s4, %s764_s16 }
  0x38   : > { %p507_p4 = por %p506_p6, %p505_p3 }
  0x39   : > { %p503_p13 = pneg %p502_p11 }
  0x3a   : > { %p509_p12 = por %p508_p10, %p507_p4 }
  0x3c   : > { %p510_p1 = pnand %p509_p12, %p503_p13 }
  0x3e   : > { %513 = shalt.err (!%p510_p1)
}
  0x3f   : > { %s514_s25 = scalar_lea.vmem %s165_s19, 128  ;;  %s618_s26 = smov [#allocation6]  }
  0x40   : > { %p515_p2 = scmp.ne.s32.totalorder %s165_s19, %s514_s25  ;;  %s519_s3 = sshll.u32 %s618_s26, 4  ;;  %s520_s3 = int_to_ptr.vmem [resolvable:$false] %s519_s3 }
  0x41   : > { %s521_s8 = scalar_lea.vmem %s520_s3, 256  ;;  %p522_p8 = scmp.lt.s32.totalorder %s165_s19, %s520_s3 }
  0x42   : > { %p517_p9 = pnand %p515_p2, %p471_p5  ;;  %p523_p7 = scmp.lt.s32.totalorder %s521_s8, %s514_s25 }
  0x44   : > { %p518_p11 = pneg %p517_p9  ;;  %p524_p3 = por %p523_p7, %p522_p8 }
  0x46   : > { %p525_p6 = pnand %p524_p3, %p518_p11 }
  0x48   : > { %528 = shalt.err (!%p525_p6)
}
  0x49   : > { %408 = dma.hbm_to_vmem [thread:$0]  (!%p719_p0), %s764_s16, 128, %s165_s19, %s153_s30  }
  0x4a   : > { %p873_p13 = scmp.ne.s32.totalorder %s872_s7, 0 }
  0x4b   : > { %s791_s15 = sand.u32 (!%p873_p13), 1, %s599_s10   ;;  %p874_p5 = scmp.ne.s32.totalorder (!%p873_p13), %s866_s21, 0 }
  0x4c   : > { %173 = sbr.rel (%p873_p13) target bundleno = 125 (0x7d), region = 28  ;;  %s389_s18 = sshll.u32 (!%p873_p13), %s791_s15, 3 }
  0x4d   : > { %s176_s4 = scalar_lea.sflag (!%p873_p13), [#allocation4], %s791_s15  ;;  %s179_s6 = scalar_lea.vmem (!%p873_p13), [#allocation3], %s389_s18 }
  0x53   : > { %582 = dma.done.wait (%p874_p5), %s176_s4, 128  }
  0x54   : > { %584 = vsyncadd (%p874_p5), %s176_s4, 4294967168  ;;  %s185_s5 = scalar_lea.sflag [#allocation7], %s791_s15  ;;  %s188_s16 = scalar_lea.vmem [#allocation6], %s389_s18 }
  0x55   : > { %586 = dma.done.wait (%p874_p5), %s185_s5, 128  }
  0x56   : > { %588 = vsyncadd (%p874_p5), %s185_s5, 4294967168  ;;  %s394_s7 = smul.u32 24, %s791_s15  ;;  %v221_v0 = vld [vmem:[%s179_s6] sm:$0xff]  ;;  %v222_v1 = vld [vmem:[%s188_s16] sm:$0xff]  ;;  %s261_s29 = scalar_lea.sflag [#allocation5], %s791_s15 }
  0x57   : > { %465 = vlog2.f32 %v221_v0  ;;  %v226_v2 = vsub.f32 1.0, %v221_v0  ;;  %v241_v3 = vmul.f32 %v222_v1, %v221_v0  ;;  %v247_v4 = vadd.f32 %v222_v1, %v221_v0  ;;  %s395_s21 = smul.u32 384, %s607_s12  ;;  %p875_p0 = scmp.ne.s32.totalorder %s867_s22, 0 }
  0x58   : > { %s213_s19 = scalar_lea.vmem [#allocation8], %s394_s7  ;;  %v231_v10 = vsub.f32 1.0, %v222_v1  ;;  %s619_s12 = smov [#allocation8]  }
  0x59   : > { %467 = vlog2.f32 %v226_v2  ;;  %258 = vst [vmem:[%s213_s19 + $0x8] sm:$0xff] %v241_v3  ;;  %259 = vst [vmem:[%s213_s19 + $0x10] sm:$0xff] %v247_v4  ;;  %s274_s30 = sshll.u32 %s213_s19, 4  ;;  %s811_s28 = scalar_lea.hbm %s862_s2, %s395_s21  ;;  %s806_s30 = int_to_ptr.vmem [resolvable:$true] %s274_s30 }
  0x5a   : > { %s529_s25 = scalar_lea.vmem %s806_s30, 384  ;;  %s533_s26 = sshll.u32 %s619_s12, 4  ;;  %s534_s26 = int_to_ptr.vmem [resolvable:$false] %s533_s26 }
  0x5b   : > { %p530_p8 = scmp.ne.s32.totalorder %s806_s30, %s529_s25  ;;  %s535_s3 = scalar_lea.vmem %s534_s26, 768 }
  0x5c   : > { %p536_p10 = scmp.lt.s32.totalorder %s806_s30, %s534_s26  ;;  %p537_p12 = scmp.lt.s32.totalorder %s535_s3, %s529_s25 }
  0x5d   : > { %p531_p7 = pnand %p530_p8, %p875_p0 }
  0x5e   : > { %p538_p1 = por %p537_p12, %p536_p10 }
  0x5f   : > { %p532_p4 = pneg %p531_p7 }
  0x61   : > { %v466_v5 = vpop.eup %465  ;;  %p539_p2 = pnand %p538_p1, %p532_p4 }
  0x62   : > { %v224_v6 = vmul.f32 0.6931472, %v466_v5 }
  0x63   : > { %v468_v7 = vpop.eup %467 }
  0x64   : > { %v225_v8 = vmax.f32 %v224_v6, -100.0  ;;  %v228_v9 = vmul.f32 0.6931472, %v468_v7 }
  0x66   : > { %v229_v11 = vmax.f32 %v228_v9, -100.0  ;;  %v230_v12 = vmul.f32 %v225_v8, %v222_v1 }
  0x68   : > { %v232_v13 = vmul.f32 %v231_v10, %v229_v11 }
  0x6a   : > { %v233_v14 = vadd.f32 %v232_v13, %v230_v12 }
  0x6c   : > { %v234_v15 = vsub.f32 0.0, %v233_v14 }
  0x6e   : > { %257 = vst [vmem:[%s213_s19] sm:$0xff] %v234_v15 }
  0x6f   : > { %542 = shalt.err (!%p539_p2)
}
  0x70   : > { %s543_s8 = scalar_lea.hbm %s811_s28, 384  ;;  %s547_s6 = scalar_lea.hbm %s862_s2, 768 }
  0x71   : > { %p544_p9 = scmp.ne.s32.totalorder %s811_s28, %s543_s8  ;;  %p548_p6 = scmp.lt.u32.totalorder %s811_s28, %s862_s2 }
  0x72   : > { %p549_p13 = scmp.lt.u32.totalorder %s547_s6, %s543_s8  ;;  %p551_p8 = scmp.lt.u32.totalorder %s543_s8, %s811_s28 }
  0x73   : > { %p545_p11 = pnand %p544_p9, %p875_p0 }
  0x74   : > { %p550_p5 = por %p549_p13, %p548_p6 }
  0x75   : > { %p546_p3 = pneg %p545_p11 }
  0x76   : > { %p552_p7 = por %p551_p8, %p550_p5 }
  0x78   : > { %p553_p4 = pnand %p552_p7, %p546_p3 }
  0x7a   : > { %556 = shalt.err (!%p553_p4)
}
  0x7b   : > { %s620_s7 = smov 128   ;;  %s621_s19 = smov 8  }
  0x7c   : > { %400 = dma.vmem_to_hbm [thread:$0]  (%p875_p0), %s806_s30, 384, %s811_s28, %s261_s29, %s620_s7, %s620_s7, %s621_s19  }
  0x7d PF: > { %s289_s21 = sand.u32 1, %s595_s9   ;;  %p876_p10 = scmp.ne.s32.totalorder %s868_s24, 0 }
  0x7e   : > { %p877_p12 = scmp.ge.s32.totalorder %s615_s14, 2  ;;  %s290_s20 = scalar_lea.sflag [#allocation5], %s289_s21 }
  0x80   : > { %p410_p1 = pnand %p877_p12, %p876_p10 }
  0x82   : > { %590 = dma.done.wait (!%p410_p1), %s290_s20, 384  }
  0x83   : > { %592 = vsyncadd (!%p410_p1), %s290_s20, 4294966912  ;;  %s21_s14 = sadd.s32 1, %s615_s14   ;;  %s878_s9 = smov %s599_s10 }
  0x84   : > { %p18_p2 = scmp.ge.s32.totalorder %s21_s14, 4   ;;  %s879_s10 = smov %s603_s11 }
  0x85   : > { %s880_s11 = smov %s693_s23  ;;  %s881_s12 = smov %s611_s13 }
  0x86   : > { %s882_s13 = smov %s884_s17  ;;  %20 = sbr.rel (!%p18_p2) target bundleno = 8 (0x8), region = 96 }
  0x8d   :  { %295 = vsyncpa [#allocation4], 1 }
  0x8e   :  { %297 = vsyncpa [#allocation4 + $0x1], 1 }
  0x8f   :  { %298 = vsyncpa [#allocation7], 1 }
  0x90   :  { %300 = vsyncpa [#allocation7 + $0x1], 1 }
  0x91   :  { %301 = vsyncpa [#allocation5], 1 }
  0x92   :  { %303 = vsyncpa [#allocation5 + $0x1], 1 }

</bundles_post_ra>
